<compile_context>
chip_gen: v7x
topology: tpu7x:2x2x1
jax: 0.10.0
libtpu: 0.0.40
codegen_flags: <defaults>
</compile_context>

<pallas_src>
import math
import functools

import jax
import jax.numpy as jnp
from jax.experimental import pallas as pl
from jax.experimental.pallas import tpu as pltpu

_LANE = 128
_SUBLANE = 8


def _round_down(x: int, m: int) -> int:
    return (x // m) * m


def _round_up(x: int, m: int) -> int:
    return ((x + m - 1) // m) * m


def _vmem_capacity_bytes() -> int:
    """Generation-aware VMEM capacity; conservative fallback if the query fails."""
    try:
        return int(pltpu.get_tpu_info().vmem_capacity_bytes)
    except Exception:
        return 64 * 1024 * 1024  # v7x per-core VMEM (smallest of the targeted chips)


def _pick_row_tile(rows: int, row_width: int, k: int) -> int:
    """Rows per grid step: VMEM-budget driven, >=2 grid steps when rows >= 16 (v7x 2 TCs)."""
    if rows < 2 * _SUBLANE:
        return rows
    budget = _vmem_capacity_bytes() // 4          # ~25% of VMEM for the pipelined tiles
    bytes_per_row = 4 * (row_width + k)           # f32 output row + f32 timesteps
    max_rows = max(_SUBLANE, budget // (2 * bytes_per_row))   # 2x: double buffering
    # Guarantee at least two grid steps so the "parallel" axis shards across both
    # TensorCores on v7x; at huge `rows` the VMEM budget dominates (~16K-row tiles).
    two_step = _round_up(pl.cdiv(rows, 2), _SUBLANE)
    tile = max(_SUBLANE, _round_down(min(max_rows, two_step), _SUBLANE))
    return tile


def _timestep_embed_kernel(t_ref, scale_ref, mask_ref, o_ref, *, k: int, half: int,
                           split: bool):
    """Compute one (rows, W) tile of sinusoidal embeddings.

    t_ref:     (rows, k)  raw timesteps (int/float); k timesteps per output row.
    scale_ref: split: (1, half) freqs;  otherwise: (k, W) per-group frequency rows.
    mask_ref:  (1, W) f32, 1.0 on cos lanes, 0.0 on sin / zero-pad lanes (unused if split).
    o_ref:     (rows, W) f32 output tile.
    """
    t = t_ref[...].astype(jnp.float32)                       # one vcvt on the VPU

    if split:
        # half is a multiple of 128: both halves are lane-aligned, so two unmasked
        # stores are optimal and cos/sin each run on fully-utilized vregs.
        args = t * scale_ref[...]                             # (rows, half)
        o_ref[:, :half] = jnp.cos(args)
        o_ref[:, half:] = jnp.sin(args)
        return

    # Lane-dense path: build the whole (rows, W) row once and issue a single store.
    if k == 1:
        args = t * scale_ref[...]                             # (rows, 1) * (1, W)
    else:
        # Expand the k timesteps across their dim-wide lane groups with k broadcast
        # FMAs (scale row g is zero outside group g and carries the freqs inside it).
        args = t[:, 0:1] * scale_ref[0:1, :]
        for g in range(1, k):
            args = args + t[:, g:g + 1] * scale_ref[g:g + 1, :]

    is_cos = mask_ref[...] > 0.5                              # (1, W) -> broadcasts
    o_ref[...] = jnp.where(is_cos, jnp.cos(args), jnp.sin(args))


def timestep_embedding(timesteps: jax.Array, dim: int, max_period: int = 10000) -> jax.Array:
    """JAX/Pallas equivalent of TimestepEmbedding.forward.

    Args:
      timesteps: 1D array of shape (B,), integer or float timesteps.
      dim: embedding dimensionality.
      max_period: maximum period of the sinusoids.

    Returns:
      float32 array of shape (B, dim).
    """
    if timesteps.ndim != 1:
        raise ValueError("Timesteps should be a 1D tensor.")

    b = timesteps.shape[0]
    half = dim // 2
    if half == 0 or b == 0:
        # dim in {0, 1}: torch path yields all zeros (empty cat, then pad for dim==1).
        return jnp.zeros((b, dim), jnp.float32)

    odd = (dim % 2 == 1)

    # Static frequency table, computed once at trace time.
    freqs = jnp.exp(
        (-math.log(float(max_period)) / half) * jnp.arange(half, dtype=jnp.float32)
    )

    # ---- layout selection -------------------------------------------------
    # Lane-dense packing: k timesteps per 128-lane output row when dim | 128.
    k = _LANE // dim if (not odd and dim <= _LANE and _LANE % dim == 0) else 1
    while k > 1 and b % k != 0:
        k //= 2
    rows = b // k
    w = k * dim
    split = (k == 1) and (not odd) and (half % _LANE == 0)

    if split:
        scale = freqs.reshape(1, half)
        mask = jnp.zeros((1, w), jnp.float32)                 # unused on this path
    elif k == 1:
        parts = [freqs, freqs]
        if odd:
            parts.append(jnp.zeros((1,), jnp.float32))        # trailing zero column
        scale = jnp.concatenate(parts).reshape(1, w)
        mask = jnp.concatenate(
            [jnp.ones((half,), jnp.float32), jnp.zeros((w - half,), jnp.float32)]
        ).reshape(1, w)
    else:
        pat = jnp.concatenate([freqs, freqs])                  # (dim,)
        eye = jnp.eye(k, dtype=jnp.float32)                    # (k, k)
        scale = (eye[:, :, None] * pat[None, None, :]).reshape(k, w)
        mask = jnp.tile(
            jnp.concatenate([jnp.ones((half,), jnp.float32),
                             jnp.zeros((half,), jnp.float32)]), k
        ).reshape(1, w)

    # Raw timesteps, k per output row; dtype cast happens inside the kernel.
    t2d = timesteps.reshape(rows, k)

    tr = _pick_row_tile(rows, w, k)
    grid = (pl.cdiv(rows, tr),)
    vmem_cap = _vmem_capacity_bytes()

    kernel = functools.partial(_timestep_embed_kernel, k=k, half=half, split=split)

    cost = pl.CostEstimate(
        flops=2 * b * dim,                    # broadcast multiplies / FMAs
        transcendentals=2 * b * dim,          # cos + sin lanes
        bytes_accessed=4 * (b * dim + b + (k + 1) * w),
    )

    out = pl.pallas_call(
        kernel,
        out_shape=jax.ShapeDtypeStruct((rows, w), jnp.float32),
        grid_spec=pltpu.PrefetchScalarGridSpec(
            num_scalar_prefetch=0,
            grid=grid,
            in_specs=[
                pl.BlockSpec((tr, k), lambda i: (i, 0)),        # timesteps tile
                pl.BlockSpec(scale.shape, lambda i: (0, 0)),    # resident freq rows
                pl.BlockSpec(mask.shape, lambda i: (0, 0)),     # resident cos-lane mask
            ],
            out_specs=pl.BlockSpec((tr, w), lambda i: (i, 0)),
        ),
        compiler_params=pltpu.CompilerParams(
            dimension_semantics=("parallel",),
            vmem_limit_bytes=int(vmem_cap // 2),
        ),
        cost_estimate=cost,
    )(t2d, scale, mask)

    # Layout-only reshape back to (B, dim): rows are contiguous, so this is free.
    return out.reshape(b, dim)


def _reference(timesteps, dim, max_period=10000):
    """Pure-JAX reference mirroring the torch module (correctness check)."""
    half = dim // 2
    if half == 0:
        return jnp.zeros((timesteps.shape[0], dim), jnp.float32)
    freqs = jnp.exp(
        -math.log(max_period) * jnp.arange(half, dtype=jnp.float32) / half
    )
    args = timesteps.astype(jnp.float32)[:, None] * freqs[None, :]
    emb = jnp.concatenate([jnp.cos(args), jnp.sin(args)], axis=-1)
    if dim % 2 == 1:
        emb = jnp.pad(emb, ((0, 0), (0, 1)))
    return emb


if __name__ == "__main__":
    key = jax.random.PRNGKey(0)
    max_period = 10000

    def check(bs, dim, k):
        t = jax.random.randint(k, (bs,), minval=0, maxval=1000, dtype=jnp.int32)
        out = jax.block_until_ready(timestep_embedding(t, dim, max_period))
        ref = _reference(t, dim, max_period)
        assert out.shape == (bs, dim), (out.shape, (bs, dim))
        # Tolerance covers f32 trig argument-reduction differences at args up to ~1e3;
        # real layout/mask bugs produce O(1) errors and would still be caught.
        max_err = float(jnp.max(jnp.abs(out - ref)))
        assert jnp.allclose(out, ref, atol=5e-4, rtol=1e-5), (
            f"mismatch vs reference (b={bs}, dim={dim}), max_abs_err={max_err}")

    keys = jax.random.split(key, 4)
    check(8, 64, keys[0])      # small batch, lane-dense packed path (k=2)
    check(8, 33, keys[1])      # odd dim -> in-kernel zero pad, single-store select path
    check(8, 256, keys[2])     # half % 128 == 0 -> lane-aligned split-store path
    check(1000, 64, keys[3])   # larger batch: >=2 grid steps + partial last tile

    print("KERNEL_OK")
</pallas_src>

<mosaic_0001>
module attributes {stable_mosaic.version = 11 : i64} {
  func.func @_timestep_embed_kernel(%arg0: i32, %arg1: memref<4x2xi32, #tpu.memory_space<vmem>>, %arg2: memref<2x128xf32, #tpu.memory_space<vmem>>, %arg3: memref<1x128xf32, #tpu.memory_space<vmem>>, %arg4: memref<4x128xf32, #tpu.memory_space<vmem>>) attributes {dimension_semantics = [#tpu.dimension_semantics<parallel>], iteration_bounds = array<i64: 1>, scalar_prefetch = 0 : i64, scratch_operands = 0 : i64, tpu.core_type = #tpu.core_type<tc>, window_params = [{transform_indices = @transform_0, window_bounds = array<i64: 4, 2>}, {pipeline_mode = #tpu.pipeline_mode<synchronous>, transform_indices = @transform_1, window_bounds = array<i64: 2, 128>}, {pipeline_mode = #tpu.pipeline_mode<synchronous>, transform_indices = @transform_2, window_bounds = array<i64: 1, 128>}, {transform_indices = @transform_3, window_bounds = array<i64: 4, 128>}]} {
    %c0 = arith.constant 0 : index
    %c0_0 = arith.constant 0 : index
    %0 = vector.load %arg1[%c0, %c0_0] : memref<4x2xi32, #tpu.memory_space<vmem>>, vector<4x2xi32>
    %1 = arith.sitofp %0 : vector<4x2xi32> to vector<4x2xf32>
    %2 = vector.extract_strided_slice %1 {offsets = [0, 0], sizes = [4, 1], strides = [1, 1]} : vector<4x2xf32> to vector<4x1xf32>
    %c0_1 = arith.constant 0 : index
    %c0_2 = arith.constant 0 : index
    %3 = vector.load %arg2[%c0_1, %c0_2] : memref<2x128xf32, #tpu.memory_space<vmem>>, vector<1x128xf32>
    %4 = vector.broadcast %2 : vector<4x1xf32> to vector<4x128xf32>
    %5 = vector.broadcast %3 : vector<1x128xf32> to vector<4x128xf32>
    %6 = arith.mulf %4, %5 : vector<4x128xf32>
    %7 = vector.extract_strided_slice %1 {offsets = [0, 1], sizes = [4, 1], strides = [1, 1]} : vector<4x2xf32> to vector<4x1xf32>
    %c1 = arith.constant 1 : index
    %c0_3 = arith.constant 0 : index
    %8 = vector.load %arg2[%c1, %c0_3] : memref<2x128xf32, #tpu.memory_space<vmem>>, vector<1x128xf32>
    %9 = vector.broadcast %7 : vector<4x1xf32> to vector<4x128xf32>
    %10 = vector.broadcast %8 : vector<1x128xf32> to vector<4x128xf32>
    %11 = arith.mulf %9, %10 : vector<4x128xf32>
    %12 = arith.addf %6, %11 : vector<4x128xf32>
    %c0_4 = arith.constant 0 : index
    %c0_5 = arith.constant 0 : index
    %13 = vector.load %arg3[%c0_4, %c0_5] : memref<1x128xf32, #tpu.memory_space<vmem>>, vector<1x128xf32>
    %cst = arith.constant 5.000000e-01 : f32
    %14 = vector.broadcast %cst : f32 to vector<1x128xf32>
    %15 = arith.cmpf ogt, %13, %14 : vector<1x128xf32>
    %16 = math.cos %12 : vector<4x128xf32>
    %17 = math.sin %12 : vector<4x128xf32>
    %18 = vector.shape_cast %15 : vector<1x128xi1> to vector<1x128xi1>
    %19 = vector.broadcast %18 : vector<1x128xi1> to vector<4x128xi1>
    %20 = arith.select %19, %16, %17 : vector<4x128xi1>, vector<4x128xf32>
    %c0_6 = arith.constant 0 : index
    %c0_7 = arith.constant 0 : index
    %21 = vector.load %arg4[%c0_6, %c0_7] : memref<4x128xf32, #tpu.memory_space<vmem>>, vector<4x128xf32>
    tpu.vector_store %arg4[%c0_6, %c0_7], %20 {strides = array<i32>} : memref<4x128xf32, #tpu.memory_space<vmem>>, vector<4x128xf32>,
    return
  }
  func.func @transform_0(%arg0: i32) -> (i32, i32) {
    %c0_i32 = arith.constant 0 : i32
    %c0_i32_0 = arith.constant 0 : i32
    return %arg0, %c0_i32 : i32, i32
  }
  func.func @transform_1(%arg0: i32) -> (i32, i32) {
    %c0_i32 = arith.constant 0 : i32
    %c0_i32_0 = arith.constant 0 : i32
    %c0_i32_1 = arith.constant 0 : i32
    return %c0_i32, %c0_i32_0 : i32, i32
  }
  func.func @transform_2(%arg0: i32) -> (i32, i32) {
    %c0_i32 = arith.constant 0 : i32
    %c0_i32_0 = arith.constant 0 : i32
    %c0_i32_1 = arith.constant 0 : i32
    return %c0_i32, %c0_i32_0 : i32, i32
  }
  func.func @transform_3(%arg0: i32) -> (i32, i32) {
    %c0_i32 = arith.constant 0 : i32
    %c0_i32_0 = arith.constant 0 : i32
    return %arg0, %c0_i32 : i32, i32
  }
}

</mosaic_0001>

<bundles_post_ra>
// kernel: tpu_custom_call.1
= control target key start
LH: loop header
LB: loop body
LE: loop exit
PB: predicated region body
PF: predicated region fallthrough
CT: control target
= control target key end

     0   :  { %v323_v1 = vmov 0   ;;  %s400_s0 = inlined_call_operand.vmem [shape: s32[4,2], index: 0, kind: input, shape index: {}]   ;;  %s401_s1 = inlined_call_operand.vmem [shape: f32[2,128], index: 1, kind: input, shape index: {}]   ;;  %s402_s2 = inlined_call_operand.vmem [shape: f32[1,128], index: 2, kind: input, shape index: {}]   ;;  %s403_s3 = inlined_call_operand.hbm [shape: f32[4,128], index: 3, kind: output, shape index: {}]  }
   0x1   :  { %v15_v0 = vld [vmem:[%s400_s0] sm:$0xf]  ;;  %293 = vset.pattern.permute.xlu0 %v323_v1 }
   0x2   :  { %v16_v2 = vcvt.s32.f32 %v15_v0 }
   0x3   :  { %8 = vsyncpa [#allocation3], 0  ;;  %v324_v3 = vmov 1   ;;  %v270_v5 = vld [vmem:[%s401_s1] ss:$0 sm:$0xff] }
   0x4   :  { %20 = vperm.xlu0 %293, %v16_v2   ;;  %v271_v6 = vld [vmem:[%s401_s1 + $0x1] ss:$0 sm:$0xff]  ;;  %v325_v21 = vmov 683565275   ;;  %v326_v23 = vmov 2475754826  }
   0x5   :  { %v327_v26 = vmov 2131351028   ;;  %v328_v29 = vmov 2102212464   ;;  %v329_v32 = vmov 920167782  }
   0x6   :  { %v330_v35 = vmov 1326507024  }
   0x8   :  { %294 = vset.pattern.permute.xlu0 %v324_v3 }
   0x9   :  { %30 = vperm.xlu0 %294, %v16_v2  }
  0x83   :  { %v21_v4 = vpop.permute.xlu0 %20 }
  0x84   :  { %v27_v8 = vmul.f32 %v270_v5, %v21_v4 }
  0x88   :  { %v31_v7 = vpop.permute.xlu0 %30 }
  0x89   :  { %v37_v9 = vmul.f32 %v271_v6, %v31_v7 }
  0x8b   :  { %v362_v10 = vadd.f32 %v37_v9, %v27_v8 }
  0x8d   :  { %v44_v11 = vand.u32 2139095040, %v362_v10  ;;  %v41_v15 = vand.u32 2147483647, %v362_v10  ;;  %vm43_vm7 = vcmp.lt.s32.totalorder %v362_v10, 0 }
  0x8f   :  { %v45_v12 = vshrl.u32 %v44_v11, 23  ;;  %v48_v18 = vand.u32 8388607, %v41_v15  ;;  %vm42_vm8 = vcmp.le.f32.partialorder %v41_v15, 0.7853982 }
  0x91   :  { %v272_v13 = vadd.s32 4294967169, %v45_v12  ;;  %v49_v37 = vor.u32 8388608, %v48_v18 }
  0x93   :  { %v51_v14 = vadd.s32 1, %v272_v13  ;;  %v89_v51 = vshll.u32 %v49_v37, 8 }
  0x95   :  { %vm52_vm0 = vcmp.gt.s32.totalorder %v51_v14, 0 }
  0x96   :  { %v53_v16 = vsel %vm52_vm0, %v51_v14, 0 }
  0x97   :  { %v55_v17 = vand.u32 31, %v53_v16  ;;  %v54_v20 = vshrl.u32 %v53_v16, 5 }
  0x99   :  { %v56_v19 = vsub.s32 32, %v55_v17  ;;  %v58_v22 = vshll.u32 %v325_v21, %v55_v17  ;;  %v61_v24 = vshll.u32 %v326_v23, %v55_v17  ;;  %v64_v28 = vshll.u32 %v327_v26, %v55_v17 }
  0x9a   :  { %v67_v31 = vshll.u32 %v328_v29, %v55_v17  ;;  %v70_v34 = vshll.u32 %v329_v32, %v55_v17  ;;  %vm73_vm1 = vcmp.lt.s32.totalorder %v54_v20, 1  ;;  %vm76_vm2 = vcmp.lt.s32.totalorder %v54_v20, 4 }
  0x9b   :  { %v59_v25 = vshrl.u32 %v326_v23, %v56_v19  ;;  %v62_v27 = vshrl.u32 %v327_v26, %v56_v19  ;;  %v65_v30 = vshrl.u32 %v328_v29, %v56_v19  ;;  %v68_v33 = vshrl.u32 %v329_v32, %v56_v19 }
  0x9c   :  { %v71_v36 = vshrl.u32 %v330_v35, %v56_v19  ;;  %v57_v46 = vshrl.u32 %v325_v21, %v56_v19  ;;  %vm75_vm3 = vcmp.lt.s32.totalorder %v54_v20, 3  ;;  %vm74_vm4 = vcmp.lt.s32.totalorder %v54_v20, 2 }
  0x9d   :  { %v60_v38 = vor.u32 %v59_v25, %v58_v22  ;;  %v63_v39 = vor.u32 %v62_v27, %v61_v24  ;;  %v66_v40 = vor.u32 %v65_v30, %v64_v28  ;;  %v69_v41 = vor.u32 %v68_v33, %v67_v31  ;;  %v39_v30 = vld [vmem:[%s402_s2] sm:$0x1]  ;;  %s331_s2 = smov [#allocation2]  }
  0x9e   :  { %v72_v42 = vor.u32 %v71_v36, %v70_v34  ;;  %v249_v26 = vlaneseq  ;;  %vm40_vm9 = vcmp.gt.f32.partialorder %v39_v30, 0.5  ;;  %s262_s18 = sshll.u32 %s331_s2, 4  ;;  %s263_s18 = int_to_ptr.vmem [resolvable:$true] %s262_s18 }
  0x9f   :  { %v78_v43 = vsel %vm76_vm2, %v66_v40, 2102212464  ;;  %v81_v44 = vsel %vm73_vm1, %v60_v38, %v63_v39  ;;  %v85_v45 = vsel %vm73_vm1, %v63_v39, %v66_v40  ;;  %v82_v47 = vsel %vm76_vm2, %v69_v41, 920167782  ;;  %s299_s19 = scalar_lea.vmem %s263_s18, 64  ;;  %p304_p1 = scmp.lt.s32.totalorder %s263_s18, %s263_s18 }
  0xa0   :  { %v86_v48 = vsel %vm76_vm2, %v72_v42, 1326507024  ;;  %v83_v49 = vsel %vm75_vm3, %v66_v40, %v82_v47  ;;  %v77_v52 = vsel %vm73_vm1, %v57_v46, %v60_v38  ;;  %v79_v53 = vsel %vm75_vm3, %v63_v39, %v78_v43  ;;  %p300_p0 = scmp.ne.s32.totalorder %s263_s18, %s299_s19  ;;  %p305_p2 = scmp.lt.s32.totalorder %s299_s19, %s299_s19 }
  0xa1   :  { %v87_v50 = vsel %vm75_vm3, %v69_v41, %v86_v48  ;;  %v84_v54 = vsel %vm74_vm4, %v81_v44, %v83_v49  ;;  %v80_v60 = vsel %vm74_vm4, %v77_v52, %v79_v53  ;;  %v250_v32 = vshrl.u32 %v249_v26, 7 }
  0xa2   :  { %v88_v55 = vsel %vm74_vm4, %v85_v45, %v87_v50  ;;  %v371_v58 = vmul.u32.u64.low %v89_v51, %v84_v54  ;;  %v372_v59 = vmul.u32.u64.high %v89_v51, %v84_v54, %v371_v58  ;;  %v96_v62 = vmul.u32 %v89_v51, %v80_v60  ;;  %p306_p3 = por %p305_p2, %p304_p1 }
  0xa3   :  { %v368_v56 = vmul.u32.u64.low %v89_v51, %v88_v55  ;;  %v369_v57 = vmul.u32.u64.high %v89_v51, %v88_v55, %v368_v56  ;;  %v251_v34 = vsub.s32 0, %v250_v32  ;;  %v248_v36 = vsel %vm40_vm9, 1, %v323_v1 }
  0xa4   :  { %v99_v61 = vadd.s32 1, %v372_v59  ;;  %vm133_vm1 = vweird.f32 %v362_v10  ;;  %p307_p4 = pnand %p306_p3, %p300_p0 }
  0xa5   :  { %vm98_vm5 = vc.u32 %v369_v57, %v371_v58  ;;  %v97_v12 = vadd.s32 %v371_v58, %v369_v57  ;;  %v252_v37 = vrot.slane %v248_v36, %v251_v34 }
  0xa6   :  { %v100_v63 = vsel %vm98_vm5, %v99_v61, %v372_v59 }
  0xa7   :  { %v101_v0 = vadd.s32 %v100_v63, %v96_v62  ;;  %vm253_vm10 = vcmp.eq.s32.totalorder %v252_v37, 1 }
  0xa9   :  { %v102_v2 = vadd.s32 536870912, %v101_v0 }
  0xab   :  { %v103_v3 = vshrl.u32 %v102_v2, 30 }
  0xad   :  { %v104_v4 = vshll.u32 %v103_v3, 30  ;;  %v127_v25 = vsub.s32 4, %v103_v3 }
  0xaf   :  { %v105_v5 = vsub.s32 %v101_v0, %v104_v4  ;;  %v128_v29 = vsel %vm43_vm7, %v127_v25, %v103_v3 }
  0xb0   :  { %v130_v33 = vsel %vm42_vm8, 0, %v128_v29 }
  0xb1   :  { %v107_v6 = vsub.s32 0, %v105_v5  ;;  %v237_v35 = vadd.s32 3, %v130_v33  ;;  %v134_v38 = vand.u32 3, %v130_v33 }
  0xb3   :  { %v273_v7 = vmin.u32 %v107_v6, %v105_v5  ;;  %v238_v39 = vand.u32 3, %v237_v35  ;;  %vm139_vm11 = vcmp.eq.s32.totalorder %v134_v38, 2  ;;  %vm136_vm13 = vcmp.eq.s32.totalorder %v134_v38, 0 }
  0xb4   :  { %vm135_vm15 = vcmp.lt.s32.totalorder %v134_v38, 2 }
  0xb5   :  { %v109_v8 = vclz %v273_v7  ;;  %vm243_vm12 = vcmp.eq.s32.totalorder %v238_v39, 2  ;;  %vm240_vm14 = vcmp.eq.s32.totalorder %v238_v39, 0  ;;  %vm239_vm0 = vcmp.lt.s32.totalorder %v238_v39, 2 }
  0xb7   :  { %v274_v9 = vadd.s32 4294967294, %v109_v8 }
  0xb9   :  { %vm275_vm6 = vcmp.lt.s32.totalorder %v274_v9, 0 }
  0xba   :  { %v112_v11 = vsel %vm275_vm6, 0, %v274_v9 }
  0xbb   :  { %v113_v13 = vsub.s32 32, %v112_v11  ;;  %v117_v14 = vsub.s32 4294967266, %v112_v11  ;;  %v114_v16 = vshll.u32 %v105_v5, %v112_v11 }
  0xbd   :  { %v115_v17 = vshrl.u32 %v97_v12, %v113_v13  ;;  %v118_v18 = vadd.s32 127, %v117_v14 }
  0xbf   :  { %v116_v19 = vor.u32 %v115_v17, %v114_v16  ;;  %v119_v20 = vshll.u32 %v118_v18, 23 }
  0xc1   :  { %v120_v21 = vor.u32 4788187, %v119_v20  ;;  %v123_v23 = vcvt.s32.f32 %v116_v19 }
  0xc3   :  { %v121_v22 = vand.u32 2147483647, %v120_v21 }
  0xc5   :  { %v124_v24 = vmul.f32 %v123_v23, %v121_v22 }
  0xc7   :  { %v125_v27 = vxor.u32 2147483648, %v124_v24 }
  0xc9   :  { %v126_v28 = vsel %vm43_vm7, %v125_v27, %v124_v24 }
  0xca   :  { %v129_v31 = vsel %vm42_vm8, %v362_v10, %v126_v28 }
  0xcb   :  { %295 = vcosq.f32 %v129_v31 }
  0xcc   :  { %297 = vsinq.f32 %v129_v31 }
  0xd5   :  { %v296_v15 = vpop.eup %295 }
  0xd6   :  { %v298_v40 = vpop.eup %297  ;;  %v140_v41 = vxor.u32 2147483648, %v296_v15 }
  0xd7   :  { %v137_v42 = vxor.u32 2147483648, %v298_v40 }
  0xd8   :  { %v141_v43 = vsel %vm139_vm11, %v140_v41, %v298_v40  ;;  %v245_v44 = vsel %vm243_vm12, %v140_v41, %v298_v40 }
  0xd9   :  { %v138_v45 = vsel %vm136_vm13, %v296_v15, %v137_v42  ;;  %v242_v1 = vsel %vm240_vm14, %v296_v15, %v137_v42 }
  0xda   :  { %v142_v46 = vsel %vm135_vm15, %v138_v45, %v141_v43  ;;  %v246_v47 = vsel %vm239_vm0, %v242_v1, %v245_v44 }
  0xdb   :  { %v143_v48 = vsel %vm133_vm1, nan, %v142_v46  ;;  %v247_v49 = vsel %vm133_vm1, nan, %v246_v47 }
  0xdc   :  { %v254_v50 = vsel %vm253_vm10, %v143_v48, %v247_v49 }
  0xdd   :  { %255 = vst [vmem:[#allocation2] sm:$0xf] %v254_v50 }
  0xde   :  { %310 = shalt.err (!%p307_p4)
}
  0xdf   :  { %s311_s22 = scalar_lea.hbm %s403_s3, 64 }
  0xe0   :  { %p312_p5 = scmp.ne.s32.totalorder %s403_s3, %s311_s22  ;;  %p315_p6 = scmp.lt.u32.totalorder %s311_s22, %s403_s3 }
  0xe2   :  { %p317_p7 = pnand %p315_p6, %p312_p5 }
  0xe4   :  { %320 = shalt.err (!%p317_p7)
}
  0xe5   :  { %265 = dma.vmem_to_hbm [thread:$0]  %s263_s18, 64, %s403_s3, [#allocation3]  }
  0xe6   :  { %321 = dma.done.wait [#allocation3], 64  }
  0xe7   :  { %322 = vsyncadd [#allocation3], 4294967232 }
  0xe8   :  { %269 = vsyncpa [#allocation3], 1 }

</bundles_post_ra>
